<compile_context>
chip_gen: v5e
topology: v5e:2x2
jax: 0.10.0
libtpu: 0.0.40
codegen_flags: <defaults>
</compile_context>

<pallas_src>
import jax
import jax.numpy as jnp
import numpy as np
from jax.experimental import pallas as pl
from jax.experimental.pallas import tpu as pltpu


def _round_up(n, m):
    return ((n + m - 1) // m) * m


def _fused_predictor_kernel(x_ref, w1_ref, b1_ref, w2_ref, b2_ref, out_ref):
    x = x_ref[...]                                                        # (TILE_N, H)
    # Fused Linear(H -> 2*Hh) for both heads
    h = jnp.dot(x, w1_ref[...], preferred_element_type=jnp.float32) + b1_ref[...]
    # LeakyReLU(negative_slope=0.2)
    h = jnp.where(h > 0, h, 0.2 * h)
    # Fused Linear(2*Hh -> 2) via block-diagonal W2: col 0 = demand, col 1 = hotness
    o = jnp.dot(h, w2_ref[...], preferred_element_type=jnp.float32) + b2_ref[...]
    # Sigmoid: exp + approximate reciprocal, both on the EUP slot
    out_ref[...] = pl.reciprocal(1.0 + jnp.exp(-o), approx=True)


def _pack_params(params):
    """Concat the two heads into one fused parameter set.

    W1: (H, 2*Hh)   B1: (1, 2*Hh)
    W2: (2*Hh, 2) block-diagonal (rows 0..Hh -> col 0, rows Hh..2Hh -> col 1)
    B2: (1, 2)
    """
    w2d, w2h = params["w2d"], params["w2h"]            # each (Hh, 1)
    zeros = jnp.zeros_like(w2d)
    W1 = jnp.concatenate([params["w1d"], params["w1h"]], axis=1)
    B1 = jnp.concatenate([params["b1d"], params["b1h"]], axis=1)
    W2 = jnp.concatenate(
        [jnp.concatenate([w2d, zeros], axis=1),
         jnp.concatenate([zeros, w2h], axis=1)], axis=0)
    B2 = jnp.concatenate([params["b2d"], params["b2h"]], axis=1)
    return W1, B1, W2, B2


def hetero_demand_hotness_forward(x, params, *, max_tile_n=512):
    """x: (N, H) float32. params: dict of weights/biases (see init_params).

    Returns (demand, hotness), each (N, 1) float32.
    """
    N, H = x.shape
    W1, B1, W2, B2 = _pack_params(params)
    Hh2 = W1.shape[1]                                   # 2 * (H // 2)

    # Tile over N; tile must be a multiple of 8 (sublane) and divide padded N.
    tile_n = min(max_tile_n, _round_up(N, 8))
    n_pad = _round_up(N, tile_n)
    if n_pad != N:
        x = jnp.pad(x, ((0, n_pad - N), (0, 0)))

    grid = (n_pad // tile_n,)

    out = pl.pallas_call(
        _fused_predictor_kernel,
        out_shape=jax.ShapeDtypeStruct((n_pad, 2), jnp.float32),
        grid=grid,
        in_specs=[
            pl.BlockSpec((tile_n, H), lambda i: (i, 0)),     # x: streamed over N
            pl.BlockSpec((H, Hh2), lambda i: (0, 0)),        # W1: resident
            pl.BlockSpec((1, Hh2), lambda i: (0, 0)),        # B1: resident
            pl.BlockSpec((Hh2, 2), lambda i: (0, 0)),        # W2: resident
            pl.BlockSpec((1, 2), lambda i: (0, 0)),          # B2: resident
        ],
        out_specs=pl.BlockSpec((tile_n, 2), lambda i: (i, 0)),
        compiler_params=pltpu.CompilerParams(
            dimension_semantics=("parallel",),               # shard N across TCs (v7x)
        ),
    )(x, W1, B1, W2, B2)

    out = out[:N]
    return out[:, 0:1], out[:, 1:2]


def init_params(key, hidden_dim):
    """Deterministic init mimicking nn.Linear default: U(-1/sqrt(fan_in), 1/sqrt(fan_in)).
    Weights stored transposed relative to PyTorch: (in_features, out_features)."""
    Hh = hidden_dim // 2
    keys = jax.random.split(key, 8)

    def linear(kw, kb, fan_in, fan_out):
        bound = 1.0 / np.sqrt(fan_in)
        w = jax.random.uniform(kw, (fan_in, fan_out), jnp.float32, -bound, bound)
        b = jax.random.uniform(kb, (1, fan_out), jnp.float32, -bound, bound)
        return w, b

    w1d, b1d = linear(keys[0], keys[1], hidden_dim, Hh)
    w2d, b2d = linear(keys[2], keys[3], Hh, 1)
    w1h, b1h = linear(keys[4], keys[5], hidden_dim, Hh)
    w2h, b2h = linear(keys[6], keys[7], Hh, 1)
    return dict(w1d=w1d, b1d=b1d, w2d=w2d, b2d=b2d,
                w1h=w1h, b1h=b1h, w2h=w2h, b2h=b2h)


def reference_forward(x, p):
    """Pure-JAX reference for correctness check."""
    def head(w1, b1, w2, b2):
        h = x @ w1 + b1
        h = jnp.where(h > 0, h, 0.2 * h)
        o = h @ w2 + b2
        return jax.nn.sigmoid(o)
    return (head(p["w1d"], p["b1d"], p["w2d"], p["b2d"]),
            head(p["w1h"], p["b1h"], p["w2h"], p["b2h"]))


if __name__ == "__main__":
    key = jax.random.PRNGKey(0)
    k_x, k_p = jax.random.split(key)

    # Small shapes consistent with the module: 8 nodes, hidden_dim=32.
    N, H = 8, 32
    x = jax.random.normal(k_x, (N, H), jnp.float32)
    params = init_params(k_p, H)

    demand, hotness = hetero_demand_hotness_forward(x, params)
    jax.block_until_ready((demand, hotness))

    ref_d, ref_h = reference_forward(x, params)
    # approx reciprocal on the EUP -> slightly looser tolerance than exact divide
    np.testing.assert_allclose(np.asarray(demand), np.asarray(ref_d), rtol=2e-3, atol=2e-3)
    np.testing.assert_allclose(np.asarray(hotness), np.asarray(ref_h), rtol=2e-3, atol=2e-3)
    assert demand.shape == (N, 1) and hotness.shape == (N, 1)

    # Second check: non-multiple N with a small tile to exercise the grid,
    # padding, resident-weight reuse across steps, and tail trimming.
    N2 = 100
    x2 = jax.random.normal(jax.random.PRNGKey(1), (N2, H), jnp.float32)
    d2, h2 = hetero_demand_hotness_forward(x2, params, max_tile_n=32)
    jax.block_until_ready((d2, h2))
    rd2, rh2 = reference_forward(x2, params)
    np.testing.assert_allclose(np.asarray(d2), np.asarray(rd2), rtol=2e-3, atol=2e-3)
    np.testing.assert_allclose(np.asarray(h2), np.asarray(rh2), rtol=2e-3, atol=2e-3)
    assert d2.shape == (N2, 1) and h2.shape == (N2, 1)

    print("KERNEL_OK")
</pallas_src>

<mosaic_0001>
module attributes {stable_mosaic.version = 11 : i64} {
  func.func @_fused_predictor_kernel(%arg0: i32, %arg1: memref<8x32xf32, #tpu.memory_space<vmem>>, %arg2: memref<32x32xf32, #tpu.memory_space<vmem>>, %arg3: memref<1x32xf32, #tpu.memory_space<vmem>>, %arg4: memref<32x2xf32, #tpu.memory_space<vmem>>, %arg5: memref<1x2xf32, #tpu.memory_space<vmem>>, %arg6: memref<8x2xf32, #tpu.memory_space<vmem>>) attributes {dimension_semantics = [#tpu.dimension_semantics<parallel>], iteration_bounds = array<i64: 1>, scalar_prefetch = 0 : i64, scratch_operands = 0 : i64, tpu.core_type = #tpu.core_type<tc>, window_params = [{transform_indices = @transform_0, window_bounds = array<i64: 8, 32>}, {pipeline_mode = #tpu.pipeline_mode<synchronous>, transform_indices = @transform_1, window_bounds = array<i64: 32, 32>}, {pipeline_mode = #tpu.pipeline_mode<synchronous>, transform_indices = @transform_2, window_bounds = array<i64: 1, 32>}, {pipeline_mode = #tpu.pipeline_mode<synchronous>, transform_indices = @transform_3, window_bounds = array<i64: 32, 2>}, {pipeline_mode = #tpu.pipeline_mode<synchronous>, transform_indices = @transform_4, window_bounds = array<i64: 1, 2>}, {transform_indices = @transform_5, window_bounds = array<i64: 8, 2>}]} {
    %c0 = arith.constant 0 : index
    %c0_0 = arith.constant 0 : index
    %0 = vector.load %arg1[%c0, %c0_0] : memref<8x32xf32, #tpu.memory_space<vmem>>, vector<8x32xf32>
    %c0_1 = arith.constant 0 : index
    %c0_2 = arith.constant 0 : index
    %1 = vector.load %arg2[%c0_1, %c0_2] : memref<32x32xf32, #tpu.memory_space<vmem>>, vector<32x32xf32>
    %cst = arith.constant dense<0.000000e+00> : vector<8x32xf32>
    %2 = tpu.matmul %0, %1, %cst {dimension_numbers = #tpu.dot_dimension_numbers<[1], [0], [0], [1], [0, 0, 1, 1], [], []>} : vector<8x32xf32>, vector<32x32xf32>, vector<8x32xf32> -> vector<8x32xf32>
    %c0_3 = arith.constant 0 : index
    %c0_4 = arith.constant 0 : index
    %3 = vector.load %arg3[%c0_3, %c0_4] : memref<1x32xf32, #tpu.memory_space<vmem>>, vector<1x32xf32>
    %4 = vector.broadcast %3 : vector<1x32xf32> to vector<8x32xf32>
    %5 = arith.addf %2, %4 : vector<8x32xf32>
    %cst_5 = arith.constant 0.000000e+00 : f32
    %6 = vector.broadcast %cst_5 : f32 to vector<8x32xf32>
    %7 = arith.cmpf ogt, %5, %6 : vector<8x32xf32>
    %cst_6 = arith.constant 2.000000e-01 : f32
    %8 = vector.broadcast %cst_6 : f32 to vector<8x32xf32>
    %9 = arith.mulf %8, %5 : vector<8x32xf32>
    %10 = arith.select %7, %5, %9 : vector<8x32xi1>, vector<8x32xf32>
    %c0_7 = arith.constant 0 : index
    %c0_8 = arith.constant 0 : index
    %11 = vector.load %arg4[%c0_7, %c0_8] : memref<32x2xf32, #tpu.memory_space<vmem>>, vector<32x2xf32>
    %cst_9 = arith.constant dense<0.000000e+00> : vector<8x2xf32>
    %12 = tpu.matmul %10, %11, %cst_9 {dimension_numbers = #tpu.dot_dimension_numbers<[1], [0], [0], [1], [0, 0, 1, 1], [], []>} : vector<8x32xf32>, vector<32x2xf32>, vector<8x2xf32> -> vector<8x2xf32>
    %c0_10 = arith.constant 0 : index
    %c0_11 = arith.constant 0 : index
    %13 = vector.load %arg5[%c0_10, %c0_11] : memref<1x2xf32, #tpu.memory_space<vmem>>, vector<1x2xf32>
    %14 = vector.broadcast %13 : vector<1x2xf32> to vector<8x2xf32>
    %15 = arith.addf %12, %14 : vector<8x2xf32>
    %cst_12 = arith.constant 0.000000e+00 : f32
    %16 = vector.broadcast %cst_12 : f32 to vector<8x2xf32>
    %17 = arith.subf %16, %15 : vector<8x2xf32>
    %18 = math.exp %17 : vector<8x2xf32>
    %cst_13 = arith.constant 1.000000e+00 : f32
    %19 = vector.broadcast %cst_13 : f32 to vector<8x2xf32>
    %20 = arith.addf %19, %18 : vector<8x2xf32>
    %21 = tpu.reciprocal %20 {approx = true} : vector<8x2xf32> -> vector<8x2xf32>
    %c0_14 = arith.constant 0 : index
    %c0_15 = arith.constant 0 : index
    %22 = vector.load %arg6[%c0_14, %c0_15] : memref<8x2xf32, #tpu.memory_space<vmem>>, vector<8x2xf32>
    tpu.vector_store %arg6[%c0_14, %c0_15], %21 {strides = array<i32>} : memref<8x2xf32, #tpu.memory_space<vmem>>, vector<8x2xf32>,
    return
  }
  func.func @transform_0(%arg0: i32) -> (i32, i32) {
    %c0_i32 = arith.constant 0 : i32
    %c0_i32_0 = arith.constant 0 : i32
    return %arg0, %c0_i32 : i32, i32
  }
  func.func @transform_1(%arg0: i32) -> (i32, i32) {
    %c0_i32 = arith.constant 0 : i32
    %c0_i32_0 = arith.constant 0 : i32
    %c0_i32_1 = arith.constant 0 : i32
    return %c0_i32, %c0_i32_0 : i32, i32
  }
  func.func @transform_2(%arg0: i32) -> (i32, i32) {
    %c0_i32 = arith.constant 0 : i32
    %c0_i32_0 = arith.constant 0 : i32
    %c0_i32_1 = arith.constant 0 : i32
    return %c0_i32, %c0_i32_0 : i32, i32
  }
  func.func @transform_3(%arg0: i32) -> (i32, i32) {
    %c0_i32 = arith.constant 0 : i32
    %c0_i32_0 = arith.constant 0 : i32
    %c0_i32_1 = arith.constant 0 : i32
    return %c0_i32, %c0_i32_0 : i32, i32
  }
  func.func @transform_4(%arg0: i32) -> (i32, i32) {
    %c0_i32 = arith.constant 0 : i32
    %c0_i32_0 = arith.constant 0 : i32
    %c0_i32_1 = arith.constant 0 : i32
    return %c0_i32, %c0_i32_0 : i32, i32
  }
  func.func @transform_5(%arg0: i32) -> (i32, i32) {
    %c0_i32 = arith.constant 0 : i32
    %c0_i32_0 = arith.constant 0 : i32
    return %arg0, %c0_i32 : i32, i32
  }
}

</mosaic_0001>

<bundles_post_ra>
// kernel: tpu_custom_call.1
= control target key start
LH: loop header
LB: loop body
LE: loop exit
PB: predicated region body
PF: predicated region fallthrough
CT: control target
= control target key end

     0   :  { %10 = vsyncpa [#allocation3], 0  ;;  %s148_s21 = smov [#allocation2]   ;;  %s215_s0 = inlined_call_operand.hbm [shape: f32[8,32], index: 0, kind: input, shape index: {}]   ;;  %s216_s1 = inlined_call_operand.vmem [shape: f32[32,32], index: 1, kind: input, shape index: {}]   ;;  %s217_s2 = inlined_call_operand.vmem [shape: f32[1,32], index: 2, kind: input, shape index: {}]   ;;  %s218_s3 = inlined_call_operand.vmem [shape: f32[32,2], index: 3, kind: input, shape index: {}]   ;;  %s219_s4 = inlined_call_operand.vmem [shape: f32[1,2], index: 4, kind: input, shape index: {}]   ;;  %s220_s5 = inlined_call_operand.vmem [shape: f32[8,2], index: 5, kind: output, shape index: {}]  }
   0x1   :  { %s16_s20 = sshll.u32 %s215_s0, 4  ;;  %s18_s22 = sshll.u32 %s148_s21, 4  ;;  %s17_s20 = int_to_ptr.hbm [resolvable:$true] %s16_s20  ;;  %s19_s22 = int_to_ptr.vmem [resolvable:$true] %s18_s22 }
   0x2   :  { %21 = dma.hbm_to_vmem [thread:$0]  %s17_s20, 128, %s19_s22, [#allocation3]  }
   0x3   :  { %146 = dma.done.wait [#allocation3], 128  }
   0x4   :  { %147 = vsyncadd [#allocation3], 4294967168  ;;  %v38_v0 = vld [vmem:[%s216_s1 + $0x18] sm:$0xff]  ;;  %v37_v1 = vld [vmem:[%s216_s1 + $0x10] sm:$0xff]  ;;  %vm43_vm0 = vcmask 261120   ;;  %vm106_vm2 = vcmask 15360  }
   0x5   :  { %59 = vmatpush.msra.mxu0 %v38_v0  ;;  %v73_v2 = vld [vmem:[%s218_s3 + $0x18] sm:$0xff]  ;;  %v36_v3 = vld [vmem:[%s216_s1 + $0x8] sm:$0xff]  ;;  %v35_v4 = vld [vmem:[%s216_s1] sm:$0xff] }
   0x6   :  { %93 = vmatpush.msra.mxu1 %v73_v2  ;;  %v34_v5 = vld [vmem:[#allocation2] sm:$0xff]  ;;  %v72_v6 = vld [vmem:[%s218_s3 + $0x10] sm:$0xff]  ;;  %v71_v7 = vld [vmem:[%s218_s3 + $0x8] sm:$0xff] }
   0x7   :  { %60 = vmatpush.msra.mxu0 %v37_v1  ;;  %v70_v8 = vld [vmem:[%s218_s3] sm:$0xff] }
   0x8   :  { %94 = vmatpush.msra.mxu1 %v72_v6  ;;  %v116_v9 = vld [vmem:[%s217_s2] ss:$0 sm:$0xff] }
   0x9   :  { %61 = vmatpush.msra.mxu0 %v36_v3  ;;  %v117_v14 = vld [vmem:[%s219_s4] ss:$0 sm:$0xff] }
   0xa   :  { %95 = vmatpush.msra.mxu1 %v71_v7 }
   0xb   :  { %62 = vmatpush.msra.mxu0 %v35_v4 }
   0xc   :  { %113 = vmatmul.msk.f32.vlgmr.msra.gmra.mxu0 %vm43_vm0, %v34_v5  ;;  %96 = vmatpush.msra.mxu1 %v70_v8 }
  0x89   :  { %v64_v10 = vpop.f32.mrf.mxu0 }
  0x8a   :  { %v65_v11 = vadd.f32 %v116_v9, %v64_v10 }
  0x8c   :  { %v68_v12 = vmul.f32 0.2, %v65_v11  ;;  %vm67_vm1 = vcmp.gt.f32.partialorder %v65_v11, 0.0 }
  0x8e   :  { %v69_v13 = vsel %vm67_vm1, %v65_v11, %v68_v12 }
  0x8f   :  { %114 = vmatmul.msk.f32.vlgmr.msra.gmra.mxu1 %vm43_vm0, %v69_v13 }
 0x10c   :  { %v98_v15 = vpop.f32.mrf.mxu1 }
 0x10d   :  { %v99_v16 = vadd.f32 %v117_v14, %v98_v15 }
 0x10f   :  { %v101_v17 = vsub.f32 0.0, %v99_v16 }
 0x111   :  { %v102_v18 = vmul.f32 1.442695, %v101_v17 }
 0x113   :  { %118 = vpow2.f32 %v102_v18 }
 0x119   :  { %v119_v19 = vpop.eup %118 }
 0x11a   :  { %v104_v20 = vadd.f32 1.0, %v119_v19 }
 0x11c   :  { %120 = vrcp.f32 %v104_v20 }
 0x122   :  { %v121_v21 = vpop.eup %120 }
 0x123   :  { %107 = vst.msk [vmem:[%s220_s5] sm:$0xff] %vm106_vm2, %v121_v21 }
 0x124   :  { %112 = vsyncpa [#allocation3], 1 }

</bundles_post_ra>
